<compile_context>
chip_gen: v6e
topology: v6e:2x2x1
jax: 0.10.0
libtpu: 0.0.40
codegen_flags: <defaults>
</compile_context>

<pallas_src>
import math
import functools

import jax
import jax.numpy as jnp
from jax.experimental import pallas as pl
from jax.experimental.pallas import tpu as pltpu


def _round_up(x, m):
    return (x + m - 1) // m * m


def _act(x, act):
    if act == "gelu":
        return 0.5 * x * (1.0 + jnp.tanh(math.sqrt(2.0 / math.pi)
                                         * (x + 0.044715 * x * x * x)))
    return jnp.maximum(x, 0.0)


# ------------------------------ Pallas kernel --------------------------------

def _embed_char_kernel(we_ref, ce_ref, pw_ref, cw_ref, cb_ref, sel_ref,
                       hw_ref, hb_ref, o_ref,
                       *, hidden, char_size, p_out, act, n_hwy):
    f32 = jnp.float32

    # ---- word path: projection weight already zero-padded to (Dw, H) -------
    emb = jnp.dot(we_ref[...], pw_ref[...], preferred_element_type=f32)  # (TN, H)

    # ---- char path: Conv2d as one banded matmul on the MXU -----------------
    # acc[n, p*C + c] = sum_{w,k} conv_w[c,w,k] * ce[n, w, p+k]
    acc = jnp.dot(ce_ref[...], cw_ref[...], preferred_element_type=f32)  # (TN, P*C)
    acc = _act(acc + cb_ref[...], act)            # bias tiled p-major, f32 math
    # max over conv positions p via static lane slices (no reshape/relayout)
    char_out = acc[:, :char_size]
    for p in range(1, p_out):
        char_out = jnp.maximum(char_out, acc[:, p * char_size:(p + 1) * char_size])

    # folded concat: place char features into their hidden columns
    emb = emb + jnp.dot(char_out.astype(sel_ref.dtype), sel_ref[...],
                        preferred_element_type=f32)                      # (TN, H)

    # ---- highway layers: fused (gate | transform) matmul (H, 2H) -----------
    for l in range(n_hwy):
        gt = jnp.dot(emb.astype(hw_ref.dtype), hw_ref[l],
                     preferred_element_type=f32) + hb_ref[l]             # (TN, 2H)
        g = jax.nn.sigmoid(gt[:, :hidden])
        t = _act(gt[:, hidden:], act)
        emb = g * t + (1.0 - g) * emb

    o_ref[...] = emb.astype(o_ref.dtype)


# ------------------------------ Wrapper ---------------------------------------

def embedding_with_char(params, x_ids, char_ids, *, act="relu", row_tile=1024,
                        compute_dtype=jnp.bfloat16):
    """Forward pass of EmbeddingWithChar (eval mode, dropout = identity).

    params: dict with torch-layout tensors:
      word_vectors (Vw, Dw), char_vec (Vc, Cc),
      proj_w (word_size, Dw)            [Linear, bias=False]
      conv_w (char_size, word_len, 1, K), conv_b (char_size,)
      hwy_gate_w / hwy_tr_w (2, H, H),  hwy_gate_b / hwy_tr_b (2, H)
    x_ids: (B, S) int32 word ids;  char_ids: (B, S, word_len) int32 char ids.
    """
    f32 = jnp.float32
    cdt = compute_dtype
    wv = params["word_vectors"].astype(cdt)
    cv = params["char_vec"].astype(cdt)
    proj_w = params["proj_w"].astype(f32)
    conv_w = params["conv_w"].astype(f32)
    conv_b = params["conv_b"].astype(f32)
    gate_w = params["hwy_gate_w"].astype(f32)
    gate_b = params["hwy_gate_b"].astype(f32)
    tr_w = params["hwy_tr_w"].astype(f32)
    tr_b = params["hwy_tr_b"].astype(f32)

    B, S = x_ids.shape
    Wl = char_ids.shape[-1]
    Dw = wv.shape[1]
    Cc = cv.shape[1]
    word_size = proj_w.shape[0]
    char_size, _, _, K = conv_w.shape
    H = word_size + char_size
    P = Cc - K + 1
    n_hwy = gate_w.shape[0]

    # ---- glue: embedding gathers (data-dependent indexing) -----------------
    N = B * S
    we = jnp.take(wv, x_ids.reshape(N), axis=0)                        # (N, Dw) bf16
    ce = jnp.take(cv, char_ids.reshape(N * Wl), axis=0).reshape(N, Wl * Cc)

    # ---- row tiling of the flattened token axis -----------------------------
    TN = min(row_tile, _round_up(N, 8))
    N_pad = _round_up(N, TN)
    if N_pad != N:
        we = jnp.pad(we, ((0, N_pad - N), (0, 0)))
        ce = jnp.pad(ce, ((0, N_pad - N), (0, 0)))

    # ---- weights re-laid-out for the kernel ---------------------------------
    # projection padded to full hidden width (folded concat, word half)
    pw_pad = jnp.zeros((Dw, H), f32).at[:, :word_size].set(proj_w.T).astype(cdt)

    # banded conv weight: W2[w*Cc + p + k, p*C + c] = conv_w[c, w, 0, k]
    cw3 = conv_w[:, :, 0, :]                                           # (C, Wl, K)
    band = jnp.zeros((Wl, Cc, P, char_size), f32)
    rows_p = jnp.arange(P)
    for k in range(K):
        band = band.at[:, rows_p + k, rows_p, :].set(cw3[:, :, k].T[:, None, :])
    cw_band = band.reshape(Wl * Cc, P * char_size).astype(cdt)
    cb_full = jnp.tile(conv_b, (P,)).reshape(1, P * char_size)         # f32, p-major

    # channel-selection matmul (folded concat, char half)
    sel = jnp.zeros((char_size, H), f32).at[:, word_size:].set(
        jnp.eye(char_size, dtype=f32)).astype(cdt)

    # fused highway weights: x @ [gate.T | transform.T]  -> (H, 2H)
    hwy_w = jnp.concatenate([jnp.transpose(gate_w, (0, 2, 1)),
                             jnp.transpose(tr_w, (0, 2, 1))], axis=-1).astype(cdt)
    hwy_b = jnp.concatenate([gate_b, tr_b], axis=-1).reshape(n_hwy, 1, 2 * H)

    kernel = functools.partial(_embed_char_kernel, hidden=H, char_size=char_size,
                               p_out=P, act=act, n_hwy=n_hwy)

    # ---- cost estimate + VMEM budget ----------------------------------------
    bpe = jnp.dtype(cdt).itemsize
    flops = 2 * N_pad * (Dw * H + (Wl * Cc) * (P * char_size)
                         + char_size * H + n_hwy * H * 2 * H)
    transcendentals = n_hwy * N_pad * H
    bytes_accessed = (N_pad * (Dw + Wl * Cc) * bpe + N_pad * H * 4
                      + (Dw * H + Wl * Cc * P * char_size + char_size * H
                         + n_hwy * H * 2 * H) * bpe
                      + (P * char_size + n_hwy * 2 * H) * 4)

    stream_bytes = 2 * TN * ((Dw + Wl * Cc) * bpe + H * 4)     # dbl-buffered rows/out
    weight_bytes = 2 * ((Dw * H + Wl * Cc * P * char_size + char_size * H
                         + n_hwy * H * 2 * H) * bpe
                        + (P * char_size + n_hwy * 2 * H) * 4)
    scratch_bytes = TN * (P * char_size + 4 * H) * 4           # f32 temporaries
    vmem_limit = int(min(48 * 2 ** 20,
                         max(8 * 2 ** 20,
                             2 * (stream_bytes + weight_bytes + scratch_bytes))))

    out = pl.pallas_call(
        kernel,
        out_shape=jax.ShapeDtypeStruct((N_pad, H), f32),
        grid_spec=pltpu.PrefetchScalarGridSpec(
            num_scalar_prefetch=0,
            grid=(N_pad // TN,),
            in_specs=[
                pl.BlockSpec((TN, Dw), lambda i: (i, 0)),
                pl.BlockSpec((TN, Wl * Cc), lambda i: (i, 0)),
                # weights: constant index maps -> DMA'd once, stay resident
                pl.BlockSpec((Dw, H), lambda i: (0, 0)),
                pl.BlockSpec((Wl * Cc, P * char_size), lambda i: (0, 0)),
                pl.BlockSpec((1, P * char_size), lambda i: (0, 0)),
                pl.BlockSpec((char_size, H), lambda i: (0, 0)),
                pl.BlockSpec((n_hwy, H, 2 * H), lambda i: (0, 0, 0)),
                pl.BlockSpec((n_hwy, 1, 2 * H), lambda i: (0, 0, 0)),
            ],
            out_specs=pl.BlockSpec((TN, H), lambda i: (i, 0)),
        ),
        compiler_params=pltpu.CompilerParams(
            dimension_semantics=("parallel",),
            vmem_limit_bytes=vmem_limit,
        ),
        cost_estimate=pl.CostEstimate(flops=flops,
                                      transcendentals=transcendentals,
                                      bytes_accessed=bytes_accessed),
    )(we, ce, pw_pad, cw_band, cb_full, sel, hwy_w, hwy_b)

    return out[:N].reshape(B, S, H)


# ------------------------- Pure-JAX reference ---------------------------------

def embedding_with_char_ref(params, x_ids, char_ids, act="relu"):
    hp = jax.lax.Precision.HIGHEST

    def act_fn(v):
        if act == "gelu":
            return 0.5 * v * (1.0 + jnp.tanh(math.sqrt(2.0 / math.pi)
                                             * (v + 0.044715 * v ** 3)))
        return jnp.maximum(v, 0.0)

    we = params["word_vectors"][x_ids]                                  # (B,S,Dw)
    we = jnp.dot(we, params["proj_w"].T, precision=hp)                  # (B,S,ws)
    ce = params["char_vec"][char_ids]                                   # (B,S,W,Cc)
    cw = params["conv_w"][:, :, 0, :]                                   # (C,W,K)
    K = cw.shape[-1]
    P = ce.shape[-1] - K + 1
    conv = jnp.stack(
        [jnp.einsum("bswk,cwk->bsc", ce[..., p:p + K], cw, precision=hp)
         for p in range(P)],
        axis=-1) + params["conv_b"][None, None, :, None]
    conv = act_fn(conv)
    char_out = jnp.max(conv, axis=-1)                                   # (B,S,C)
    emb = jnp.concatenate([we, char_out], axis=-1)
    for l in range(params["hwy_gate_w"].shape[0]):
        g = jax.nn.sigmoid(jnp.dot(emb, params["hwy_gate_w"][l].T, precision=hp)
                           + params["hwy_gate_b"][l])
        t = act_fn(jnp.dot(emb, params["hwy_tr_w"][l].T, precision=hp)
                   + params["hwy_tr_b"][l])
        emb = g * t + (1.0 - g) * emb
    return emb


# ------------------------------ Test ------------------------------------------

if __name__ == "__main__":
    key = jax.random.PRNGKey(0)
    B, S, Wl = 2, 8, 4                 # batch, seq_len, chars per word
    vocab_w, vocab_c = 50, 30
    Dw, Cc = 64, 16                    # word-vec dim, char-vec dim (>= 5)
    hidden = 32
    char_prop = 0.2
    char_size = int(hidden * char_prop)    # 6
    word_size = hidden - char_size         # 26
    K = 5
    n_hwy = 2

    ks = jax.random.split(key, 11)
    params = dict(
        word_vectors=jax.random.normal(ks[0], (vocab_w, Dw), jnp.float32),
        char_vec=jax.random.uniform(ks[1], (vocab_c, Cc), jnp.float32, -0.1, 0.1),
        proj_w=0.1 * jax.random.normal(ks[2], (word_size, Dw), jnp.float32),
        conv_w=0.1 * jax.random.normal(ks[3], (char_size, Wl, 1, K), jnp.float32),
        conv_b=0.1 * jax.random.normal(ks[4], (char_size,), jnp.float32),
        hwy_gate_w=0.1 * jax.random.normal(ks[5], (n_hwy, hidden, hidden), jnp.float32),
        hwy_gate_b=0.1 * jax.random.normal(ks[6], (n_hwy, hidden), jnp.float32),
        hwy_tr_w=0.1 * jax.random.normal(ks[7], (n_hwy, hidden, hidden), jnp.float32),
        hwy_tr_b=0.1 * jax.random.normal(ks[8], (n_hwy, hidden), jnp.float32),
    )
    x_ids = jax.random.randint(ks[9], (B, S), 0, vocab_w)
    char_ids = jax.random.randint(ks[10], (B, S, Wl), 0, vocab_c)

    out = embedding_with_char(params, x_ids, char_ids, act="relu")
    out = jax.block_until_ready(out)

    ref = embedding_with_char_ref(params, x_ids, char_ids, act="relu")
    assert out.shape == (B, S, hidden)
    max_err = float(jnp.max(jnp.abs(out - ref)))
    # bf16 matmul inputs vs f32 HIGHEST reference -> bf16-level tolerance
    assert jnp.allclose(out, ref, atol=2e-2, rtol=2e-2), max_err

    print("KERNEL_OK")
</pallas_src>

<mosaic_0001>
module attributes {stable_mosaic.version = 11 : i64} {
  func.func @_embed_char_kernel(%arg0: i32, %arg1: memref<16x64xbf16, #tpu.memory_space<vmem>>, %arg2: memref<16x64xbf16, #tpu.memory_space<vmem>>, %arg3: memref<64x32xbf16, #tpu.memory_space<vmem>>, %arg4: memref<64x72xbf16, #tpu.memory_space<vmem>>, %arg5: memref<1x72xf32, #tpu.memory_space<vmem>>, %arg6: memref<6x32xbf16, #tpu.memory_space<vmem>>, %arg7: memref<2x32x64xbf16, #tpu.memory_space<vmem>>, %arg8: memref<2x1x64xf32, #tpu.memory_space<vmem>>, %arg9: memref<16x32xf32, #tpu.memory_space<vmem>>) attributes {dimension_semantics = [#tpu.dimension_semantics<parallel>], iteration_bounds = array<i64: 1>, scalar_prefetch = 0 : i64, scratch_operands = 0 : i64, tpu.core_type = #tpu.core_type<tc>, window_params = [{transform_indices = @transform_0, window_bounds = array<i64: 16, 64>}, {transform_indices = @transform_1, window_bounds = array<i64: 16, 64>}, {pipeline_mode = #tpu.pipeline_mode<synchronous>, transform_indices = @transform_2, window_bounds = array<i64: 64, 32>}, {pipeline_mode = #tpu.pipeline_mode<synchronous>, transform_indices = @transform_3, window_bounds = array<i64: 64, 72>}, {pipeline_mode = #tpu.pipeline_mode<synchronous>, transform_indices = @transform_4, window_bounds = array<i64: 1, 72>}, {pipeline_mode = #tpu.pipeline_mode<synchronous>, transform_indices = @transform_5, window_bounds = array<i64: 6, 32>}, {pipeline_mode = #tpu.pipeline_mode<synchronous>, transform_indices = @transform_6, window_bounds = array<i64: 2, 32, 64>}, {pipeline_mode = #tpu.pipeline_mode<synchronous>, transform_indices = @transform_7, window_bounds = array<i64: 2, 1, 64>}, {transform_indices = @transform_8, window_bounds = array<i64: 16, 32>}]} {
    %c0 = arith.constant 0 : index
    %c0_0 = arith.constant 0 : index
    %0 = vector.load %arg1[%c0, %c0_0] : memref<16x64xbf16, #tpu.memory_space<vmem>>, vector<16x64xbf16>
    %c0_1 = arith.constant 0 : index
    %c0_2 = arith.constant 0 : index
    %1 = vector.load %arg3[%c0_1, %c0_2] : memref<64x32xbf16, #tpu.memory_space<vmem>>, vector<64x32xbf16>
    %cst = arith.constant dense<0.000000e+00> : vector<16x32xf32>
    %2 = tpu.matmul %0, %1, %cst {dimension_numbers = #tpu.dot_dimension_numbers<[1], [0], [0], [1], [0, 0, 1, 1], [], []>} : vector<16x64xbf16>, vector<64x32xbf16>, vector<16x32xf32> -> vector<16x32xf32>
    %c0_3 = arith.constant 0 : index
    %c0_4 = arith.constant 0 : index
    %3 = vector.load %arg2[%c0_3, %c0_4] : memref<16x64xbf16, #tpu.memory_space<vmem>>, vector<16x64xbf16>
    %c0_5 = arith.constant 0 : index
    %c0_6 = arith.constant 0 : index
    %4 = vector.load %arg4[%c0_5, %c0_6] : memref<64x72xbf16, #tpu.memory_space<vmem>>, vector<64x72xbf16>
    %cst_7 = arith.constant dense<0.000000e+00> : vector<16x72xf32>
    %5 = tpu.matmul %3, %4, %cst_7 {dimension_numbers = #tpu.dot_dimension_numbers<[1], [0], [0], [1], [0, 0, 1, 1], [], []>} : vector<16x64xbf16>, vector<64x72xbf16>, vector<16x72xf32> -> vector<16x72xf32>
    %c0_8 = arith.constant 0 : index
    %c0_9 = arith.constant 0 : index
    %6 = vector.load %arg5[%c0_8, %c0_9] : memref<1x72xf32, #tpu.memory_space<vmem>>, vector<1x72xf32>
    %7 = vector.broadcast %6 : vector<1x72xf32> to vector<16x72xf32>
    %8 = arith.addf %5, %7 : vector<16x72xf32>
    %cst_10 = arith.constant 0.000000e+00 : f32
    %9 = vector.broadcast %cst_10 : f32 to vector<16x72xf32>
    %10 = arith.maximumf %8, %9 : vector<16x72xf32>
    %11 = vector.extract_strided_slice %10 {offsets = [0, 0], sizes = [16, 6], strides = [1, 1]} : vector<16x72xf32> to vector<16x6xf32>
    %12 = vector.extract_strided_slice %10 {offsets = [0, 6], sizes = [16, 6], strides = [1, 1]} : vector<16x72xf32> to vector<16x6xf32>
    %13 = arith.maximumf %11, %12 : vector<16x6xf32>
    %14 = vector.extract_strided_slice %10 {offsets = [0, 12], sizes = [16, 6], strides = [1, 1]} : vector<16x72xf32> to vector<16x6xf32>
    %15 = arith.maximumf %13, %14 : vector<16x6xf32>
    %16 = vector.extract_strided_slice %10 {offsets = [0, 18], sizes = [16, 6], strides = [1, 1]} : vector<16x72xf32> to vector<16x6xf32>
    %17 = arith.maximumf %15, %16 : vector<16x6xf32>
    %18 = vector.extract_strided_slice %10 {offsets = [0, 24], sizes = [16, 6], strides = [1, 1]} : vector<16x72xf32> to vector<16x6xf32>
    %19 = arith.maximumf %17, %18 : vector<16x6xf32>
    %20 = vector.extract_strided_slice %10 {offsets = [0, 30], sizes = [16, 6], strides = [1, 1]} : vector<16x72xf32> to vector<16x6xf32>
    %21 = arith.maximumf %19, %20 : vector<16x6xf32>
    %22 = vector.extract_strided_slice %10 {offsets = [0, 36], sizes = [16, 6], strides = [1, 1]} : vector<16x72xf32> to vector<16x6xf32>
    %23 = arith.maximumf %21, %22 : vector<16x6xf32>
    %24 = vector.extract_strided_slice %10 {offsets = [0, 42], sizes = [16, 6], strides = [1, 1]} : vector<16x72xf32> to vector<16x6xf32>
    %25 = arith.maximumf %23, %24 : vector<16x6xf32>
    %26 = vector.extract_strided_slice %10 {offsets = [0, 48], sizes = [16, 6], strides = [1, 1]} : vector<16x72xf32> to vector<16x6xf32>
    %27 = arith.maximumf %25, %26 : vector<16x6xf32>
    %28 = vector.extract_strided_slice %10 {offsets = [0, 54], sizes = [16, 6], strides = [1, 1]} : vector<16x72xf32> to vector<16x6xf32>
    %29 = arith.maximumf %27, %28 : vector<16x6xf32>
    %30 = vector.extract_strided_slice %10 {offsets = [0, 60], sizes = [16, 6], strides = [1, 1]} : vector<16x72xf32> to vector<16x6xf32>
    %31 = arith.maximumf %29, %30 : vector<16x6xf32>
    %32 = vector.extract_strided_slice %10 {offsets = [0, 66], sizes = [16, 6], strides = [1, 1]} : vector<16x72xf32> to vector<16x6xf32>
    %33 = arith.maximumf %31, %32 : vector<16x6xf32>
    %34 = arith.truncf %33 : vector<16x6xf32> to vector<16x6xbf16>
    %c0_11 = arith.constant 0 : index
    %c0_12 = arith.constant 0 : index
    %35 = vector.load %arg6[%c0_11, %c0_12] : memref<6x32xbf16, #tpu.memory_space<vmem>>, vector<6x32xbf16>
    %cst_13 = arith.constant dense<0.000000e+00> : vector<16x32xf32>
    %36 = tpu.matmul %34, %35, %cst_13 {dimension_numbers = #tpu.dot_dimension_numbers<[1], [0], [0], [1], [0, 0, 1, 1], [], []>} : vector<16x6xbf16>, vector<6x32xbf16>, vector<16x32xf32> -> vector<16x32xf32>
    %37 = arith.addf %2, %36 : vector<16x32xf32>
    %38 = arith.truncf %37 : vector<16x32xf32> to vector<16x32xbf16>
    %c0_14 = arith.constant 0 : index
    %c0_15 = arith.constant 0 : index
    %c0_16 = arith.constant 0 : index
    %39 = vector.load %arg7[%c0_14, %c0_15, %c0_16] : memref<2x32x64xbf16, #tpu.memory_space<vmem>>, vector<1x32x64xbf16>
    %40 = vector.shape_cast %39 : vector<1x32x64xbf16> to vector<32x64xbf16>
    %cst_17 = arith.constant dense<0.000000e+00> : vector<16x64xf32>
    %41 = tpu.matmul %38, %40, %cst_17 {dimension_numbers = #tpu.dot_dimension_numbers<[1], [0], [0], [1], [0, 0, 1, 1], [], []>} : vector<16x32xbf16>, vector<32x64xbf16>, vector<16x64xf32> -> vector<16x64xf32>
    %c0_18 = arith.constant 0 : index
    %c0_19 = arith.constant 0 : index
    %c0_20 = arith.constant 0 : index
    %42 = vector.load %arg8[%c0_18, %c0_19, %c0_20] : memref<2x1x64xf32, #tpu.memory_space<vmem>>, vector<1x1x64xf32>
    %43 = vector.shape_cast %42 : vector<1x1x64xf32> to vector<1x64xf32>
    %44 = vector.broadcast %43 : vector<1x64xf32> to vector<16x64xf32>
    %45 = arith.addf %41, %44 : vector<16x64xf32>
    %46 = vector.extract_strided_slice %45 {offsets = [0, 0], sizes = [16, 32], strides = [1, 1]} : vector<16x64xf32> to vector<16x32xf32>
    %47 = arith.negf %46 : vector<16x32xf32>
    %48 = math.exp %47 : vector<16x32xf32>
    %cst_21 = arith.constant 1.000000e+00 : f32
    %49 = vector.broadcast %cst_21 : f32 to vector<16x32xf32>
    %50 = arith.addf %49, %48 : vector<16x32xf32>
    %51 = arith.divf %49, %50 : vector<16x32xf32>
    %52 = vector.extract_strided_slice %45 {offsets = [0, 32], sizes = [16, 32], strides = [1, 1]} : vector<16x64xf32> to vector<16x32xf32>
    %cst_22 = arith.constant 0.000000e+00 : f32
    %53 = vector.broadcast %cst_22 : f32 to vector<16x32xf32>
    %54 = arith.maximumf %52, %53 : vector<16x32xf32>
    %55 = arith.mulf %51, %54 : vector<16x32xf32>
    %cst_23 = arith.constant 1.000000e+00 : f32
    %56 = vector.broadcast %cst_23 : f32 to vector<16x32xf32>
    %57 = arith.subf %56, %51 : vector<16x32xf32>
    %58 = arith.mulf %57, %37 : vector<16x32xf32>
    %59 = arith.addf %55, %58 : vector<16x32xf32>
    %60 = arith.truncf %59 : vector<16x32xf32> to vector<16x32xbf16>
    %c1 = arith.constant 1 : index
    %c0_24 = arith.constant 0 : index
    %c0_25 = arith.constant 0 : index
    %61 = vector.load %arg7[%c1, %c0_24, %c0_25] : memref<2x32x64xbf16, #tpu.memory_space<vmem>>, vector<1x32x64xbf16>
    %62 = vector.shape_cast %61 : vector<1x32x64xbf16> to vector<32x64xbf16>
    %cst_26 = arith.constant dense<0.000000e+00> : vector<16x64xf32>
    %63 = tpu.matmul %60, %62, %cst_26 {dimension_numbers = #tpu.dot_dimension_numbers<[1], [0], [0], [1], [0, 0, 1, 1], [], []>} : vector<16x32xbf16>, vector<32x64xbf16>, vector<16x64xf32> -> vector<16x64xf32>
    %c1_27 = arith.constant 1 : index
    %c0_28 = arith.constant 0 : index
    %c0_29 = arith.constant 0 : index
    %64 = vector.load %arg8[%c1_27, %c0_28, %c0_29] : memref<2x1x64xf32, #tpu.memory_space<vmem>>, vector<1x1x64xf32>
    %65 = vector.shape_cast %64 : vector<1x1x64xf32> to vector<1x64xf32>
    %66 = vector.broadcast %65 : vector<1x64xf32> to vector<16x64xf32>
    %67 = arith.addf %63, %66 : vector<16x64xf32>
    %68 = vector.extract_strided_slice %67 {offsets = [0, 0], sizes = [16, 32], strides = [1, 1]} : vector<16x64xf32> to vector<16x32xf32>
    %69 = arith.negf %68 : vector<16x32xf32>
    %70 = math.exp %69 : vector<16x32xf32>
    %cst_30 = arith.constant 1.000000e+00 : f32
    %71 = vector.broadcast %cst_30 : f32 to vector<16x32xf32>
    %72 = arith.addf %71, %70 : vector<16x32xf32>
    %73 = arith.divf %71, %72 : vector<16x32xf32>
    %74 = vector.extract_strided_slice %67 {offsets = [0, 32], sizes = [16, 32], strides = [1, 1]} : vector<16x64xf32> to vector<16x32xf32>
    %cst_31 = arith.constant 0.000000e+00 : f32
    %75 = vector.broadcast %cst_31 : f32 to vector<16x32xf32>
    %76 = arith.maximumf %74, %75 : vector<16x32xf32>
    %77 = arith.mulf %73, %76 : vector<16x32xf32>
    %cst_32 = arith.constant 1.000000e+00 : f32
    %78 = vector.broadcast %cst_32 : f32 to vector<16x32xf32>
    %79 = arith.subf %78, %73 : vector<16x32xf32>
    %80 = arith.mulf %79, %59 : vector<16x32xf32>
    %81 = arith.addf %77, %80 : vector<16x32xf32>
    %c0_33 = arith.constant 0 : index
    %c0_34 = arith.constant 0 : index
    %82 = vector.load %arg9[%c0_33, %c0_34] : memref<16x32xf32, #tpu.memory_space<vmem>>, vector<16x32xf32>
    tpu.vector_store %arg9[%c0_33, %c0_34], %81 {strides = array<i32>} : memref<16x32xf32, #tpu.memory_space<vmem>>, vector<16x32xf32>,
    return
  }
  func.func @transform_0(%arg0: i32) -> (i32, i32) {
    %c0_i32 = arith.constant 0 : i32
    %c0_i32_0 = arith.constant 0 : i32
    return %arg0, %c0_i32 : i32, i32
  }
  func.func @transform_1(%arg0: i32) -> (i32, i32) {
    %c0_i32 = arith.constant 0 : i32
    %c0_i32_0 = arith.constant 0 : i32
    return %arg0, %c0_i32 : i32, i32
  }
  func.func @transform_2(%arg0: i32) -> (i32, i32) {
    %c0_i32 = arith.constant 0 : i32
    %c0_i32_0 = arith.constant 0 : i32
    %c0_i32_1 = arith.constant 0 : i32
    return %c0_i32, %c0_i32_0 : i32, i32
  }
  func.func @transform_3(%arg0: i32) -> (i32, i32) {
    %c0_i32 = arith.constant 0 : i32
    %c0_i32_0 = arith.constant 0 : i32
    %c0_i32_1 = arith.constant 0 : i32
    return %c0_i32, %c0_i32_0 : i32, i32
  }
  func.func @transform_4(%arg0: i32) -> (i32, i32) {
    %c0_i32 = arith.constant 0 : i32
    %c0_i32_0 = arith.constant 0 : i32
    %c0_i32_1 = arith.constant 0 : i32
    return %c0_i32, %c0_i32_0 : i32, i32
  }
  func.func @transform_5(%arg0: i32) -> (i32, i32) {
    %c0_i32 = arith.constant 0 : i32
    %c0_i32_0 = arith.constant 0 : i32
    %c0_i32_1 = arith.constant 0 : i32
    return %c0_i32, %c0_i32_0 : i32, i32
  }
  func.func @transform_6(%arg0: i32) -> (i32, i32, i32) {
    %c0_i32 = arith.constant 0 : i32
    %c0_i32_0 = arith.constant 0 : i32
    %c0_i32_1 = arith.constant 0 : i32
    %c0_i32_2 = arith.constant 0 : i32
    return %c0_i32, %c0_i32_0, %c0_i32_1 : i32, i32, i32
  }
  func.func @transform_7(%arg0: i32) -> (i32, i32, i32) {
    %c0_i32 = arith.constant 0 : i32
    %c0_i32_0 = arith.constant 0 : i32
    %c0_i32_1 = arith.constant 0 : i32
    %c0_i32_2 = arith.constant 0 : i32
    return %c0_i32, %c0_i32_0, %c0_i32_1 : i32, i32, i32
  }
  func.func @transform_8(%arg0: i32) -> (i32, i32) {
    %c0_i32 = arith.constant 0 : i32
    %c0_i32_0 = arith.constant 0 : i32
    return %arg0, %c0_i32 : i32, i32
  }
}

</mosaic_0001>

<bundles_post_ra>
// kernel: tpu_custom_call.1
= control target key start
LH: loop header
LB: loop body
LE: loop exit
PB: predicated region body
PF: predicated region fallthrough
CT: control target
= control target key end

     0   :  { %13 = vsyncpa [#allocation3], 0  ;;  %s966_s0 = inlined_call_operand.vmem [shape: bf16[16,64], index: 0, kind: input, shape index: {}]   ;;  %s967_s1 = inlined_call_operand.vmem [shape: bf16[16,64], index: 1, kind: input, shape index: {}]   ;;  %s968_s2 = inlined_call_operand.vmem [shape: bf16[64,32], index: 2, kind: input, shape index: {}]   ;;  %s969_s3 = inlined_call_operand.vmem [shape: bf16[64,72], index: 3, kind: input, shape index: {}]   ;;  %s970_s4 = inlined_call_operand.vmem [shape: f32[1,72], index: 4, kind: input, shape index: {}]   ;;  %s971_s5 = inlined_call_operand.vmem [shape: bf16[6,32], index: 5, kind: input, shape index: {}]   ;;  %s972_s6 = inlined_call_operand.hbm [shape: bf16[2,32,64], index: 6, kind: input, shape index: {}]   ;;  %s973_s7 = inlined_call_operand.vmem [shape: f32[2,1,64], index: 7, kind: input, shape index: {}]   ;;  %s974_s8 = inlined_call_operand.hbm [shape: f32[16,32], index: 8, kind: output, shape index: {}]  }
   0x1   :  { %14 = vsyncpa [#allocation4], 0  ;;  %s820_s27 = smov [#allocation2]  }
   0x2   :  { %s32_s28 = sshll.u32 %s820_s27, 4  ;;  %s33_s28 = int_to_ptr.vmem [resolvable:$true] %s32_s28 }
   0x3   :  { %s784_s29 = scalar_lea.vmem %s33_s28, 512  ;;  %p789_p1 = scmp.lt.s32.totalorder %s33_s28, %s33_s28 }
   0x4   :  { %p785_p0 = scmp.ne.s32.totalorder %s33_s28, %s784_s29  ;;  %p790_p2 = scmp.lt.s32.totalorder %s784_s29, %s784_s29 }
   0x6   :  { %p791_p3 = por %p790_p2, %p789_p1 }
   0x8   :  { %p792_p4 = pnand %p791_p3, %p785_p0 }
   0xa   :  { %795 = shalt.err (!%p792_p4)
}
   0xb   :  { %s821_s30 = smov 64   ;;  %s822_s9 = smov 4  }
   0xc   :  { %38 = dma.hbm_to_vmem [thread:$0]  %s972_s6, 512, %s33_s28, [#allocation3], %s821_s30, %s821_s30, %s822_s9  }
   0xd   :  { %816 = dma.done.wait [#allocation3], 512  }
   0xe   :  { %817 = vsyncadd [#allocation3], 4294966784  ;;  %v823_v0 = vmov 0.0   ;;  %vm824_vm0 = vmmov 0   ;;  %v746_v1 = vld [vmem:[%s969_s3 + $0x18] sm:$0xff]   ;;  %v747_v2 = vld [vmem:[%s969_s3 + $0x10] sm:$0xff]  }
   0xf   :  { %625 = vmatprep.subr.bf16.mxu0 %v823_v0  ;;  %633 = vmatprep.mubr.msk.bf16.mxu0 %vm824_vm0, %v823_v0  ;;  %v748_v3 = vld [vmem:[%s969_s3 + $0x8] sm:$0xff]   ;;  %v749_v4 = vld [vmem:[%s969_s3] sm:$0xff]   ;;  %vm101_vm1 = vcmask 523264   ;;  %s826_s3 = smov 122   ;;  %s827_s23 = smov 104   ;;  %vm244_vm2 = vcmask 1042432  }
  0x10   :  { %637 = vmatprep.subr.bf16.mxu1 %v823_v0  ;;  %639 = vmatprep.mubr.msk.bf16.mxu1 %vm824_vm0, %v823_v0  ;;  %v750_v5 = vld [vmem:[%s967_s1] sm:$0xff]   ;;  %s825_s1 = smov 110   ;;  %s828_s24 = smov 116   ;;  %vm240_vm3 = vcmask 48128   ;;  %vm386_vm4 = vcmask 261120  }
  0x11   :  { %626 = vmatpush3.bf16.msra.mxu0 %v746_v1  ;;  %v580_v6 = vld [vmem:[%s970_s4] ss:$0 sm:$0xff]  ;;  %s829_s25 = smov 92   ;;  %s830_s4 = smov 98  }
  0x12   :  { %627 = vmatprep.subr.bf16.mxu0 %v823_v0  ;;  %v239_v16 = vld [vmem:[%s971_s5] sm:$0x7]  ;;  %s831_s28 = smov 80   ;;  %s832_s29 = smov 86  }
  0x13   :  { %v246_v17 = vsel %vm244_vm2, %v239_v16, 0  ;;  %s833_s30 = smov 68   ;;  %s834_s9 = smov 74   ;;  %v756_v16 = vld [vmem:[#allocation2 + $0x8] sm:$0xff]  }
  0x14   :  { %638 = vmatpush3.bf16.msra.mxu1 %v246_v17  ;;  %s835_s10 = smov 62   ;;  %v757_v17 = vld [vmem:[#allocation2] sm:$0xff]   ;;  %s836_s19 = smov 96  }
  0x15   :  { %628 = vmatpush3.bf16.msra.mxu0 %v747_v2  ;;  %643 = vmatprep.subr.bf16.mxu1 %v823_v0 }
  0x16   :  { %629 = vmatprep.subr.bf16.mxu0 %v823_v0 }
  0x19   :  { %630 = vmatpush3.bf16.msra.mxu0 %v748_v3 }
  0x1a   :  { %631 = vmatprep.subr.bf16.mxu0 %v823_v0 }
  0x1d   :  { %632 = vmatpush3.bf16.msra.mxu0 %v749_v4 }
  0x1e   :  { %655 = vmatprep.subr.bf16.mxu0 %v823_v0 }
  0x20   :  { %634 = vmatmul.mubr.msk.bf16.vlgmr.msra.gmra.mxu0 %vm101_vm1, %v750_v5 }
  0x21   :  { %659 = vmatprep.mubr.msk.bf16.mxu0 %vm824_vm0, %v823_v0  ;;  %656 = vmatpush3.bf16.msra.mxu0 %v756_v16 }
  0x22   :  { %657 = vmatprep.subr.bf16.mxu0 %v823_v0 }
  0x25   :  { %658 = vmatpush3.bf16.msra.mxu0 %v757_v17 }
  0xe0   :  { %v139_v7 = vpop.f32.mrf.mxu0 }
  0xe1   :  { %v140_v9 = vadd.f32 %v580_v6, %v139_v7 }
  0xe2   :  { %v635_v8 = vpop.f32.mrf.mxu0 }
  0xe3   :  { %v146_v13 = vmax.f32 %v140_v9, 0.0 }
  0xe4   :  { %v142_v10 = vpop.f32.mrf.mxu0 }
  0xe5   :  { %v143_v11 = vadd.f32 %v580_v6, %v142_v10  ;;  %v751_v10 = vld [vmem:[%s968_s2 + $0x18] sm:$0xff]  }
  0xe6   :  { %v636_v12 = vpop.f32.mrf.mxu0 }
  0xe7   :  { %v147_v14 = vmax.f32 %v143_v11, 0.0  ;;  %v752_v12 = vld [vmem:[%s968_s2 + $0x10] sm:$0xff]  }
  0xe9   :  { %v701_v15 = vpack.i.bf16 %v147_v14, %v146_v13 }
  0xeb   :  { %702 = vrot.lane.b32.xlu1 %v701_v15, %s825_s1  ;;  %692 = vrot.lane.b32.xlu0 %v701_v15, %s826_s3 }
  0xef   :  { %707 = vrot.lane.b32.xlu1 %v701_v15, %s827_s23  ;;  %697 = vrot.lane.b32.xlu0 %v701_v15, %s828_s24 }
  0xf3   :  { %717 = vrot.lane.b32.xlu1 %v701_v15, %s829_s25  ;;  %712 = vrot.lane.b32.xlu0 %v701_v15, %s830_s4 }
  0xf7   :  { %727 = vrot.lane.b32.xlu1 %v701_v15, %s831_s28  ;;  %722 = vrot.lane.b32.xlu0 %v701_v15, %s832_s29 }
  0xfb   :  { %737 = vrot.lane.b32.xlu1 %v701_v15, %s833_s30  ;;  %732 = vrot.lane.b32.xlu0 %v701_v15, %s834_s9 }
  0xff   :  { %742 = vrot.lane.b32.xlu0 %v701_v15, %s835_s10  ;;  %v755_v15 = vld [vmem:[%s966_s0] sm:$0xff]  }
 0x15d   :  { %v703_v18 = vpop.permute.xlu1 %702  ;;  %v693_v19 = vpop.permute.xlu0 %692 }
 0x15e   :  { %v695_v20 = vunpack.i.h.bf16 %v693_v19  ;;  %v694_v21 = vunpack.i.l.bf16 %v693_v19  ;;  %v705_v28 = vunpack.i.h.bf16 %v703_v18  ;;  %v704_v29 = vunpack.i.l.bf16 %v703_v18 }
 0x160   :  { %v157_v24 = vmax.f32 %v147_v14, %v695_v20  ;;  %v156_v25 = vmax.f32 %v146_v13, %v694_v21  ;;  %v753_v13 = vld [vmem:[%s968_s2 + $0x8] sm:$0xff]   ;;  %v754_v14 = vld [vmem:[%s968_s2] sm:$0xff]  }
 0x161   :  { %v708_v22 = vpop.permute.xlu1 %707  ;;  %v698_v23 = vpop.permute.xlu0 %697 }
 0x162   :  { %v700_v26 = vunpack.i.h.bf16 %v698_v23  ;;  %v699_v27 = vunpack.i.l.bf16 %v698_v23  ;;  %v710_v34 = vunpack.i.h.bf16 %v708_v22  ;;  %v709_v35 = vunpack.i.l.bf16 %v708_v22 }
 0x164   :  { %v164_v30 = vmax.f32 %v156_v25, %v699_v27  ;;  %v165_v31 = vmax.f32 %v157_v24, %v700_v26 }
 0x165   :  { %v718_v32 = vpop.permute.xlu1 %717  ;;  %v713_v33 = vpop.permute.xlu0 %712 }
 0x166   :  { %v172_v36 = vmax.f32 %v164_v30, %v704_v29  ;;  %v173_v37 = vmax.f32 %v165_v31, %v705_v28  ;;  %v715_v38 = vunpack.i.h.bf16 %v713_v33  ;;  %v714_v39 = vunpack.i.l.bf16 %v713_v33  ;;  %v758_v29 = vld [vmem:[#allocation2 + $0x18] sm:$0xff]   ;;  %v594_v30 = vld [vmem:[%s973_s7] ss:$0 sm:$0xff]  ;;  %v759_v31 = vld [vmem:[#allocation2 + $0x10] sm:$0xff]  }
 0x167   :  { %v720_v44 = vunpack.i.h.bf16 %v718_v32  ;;  %v719_v45 = vunpack.i.l.bf16 %v718_v32 }
 0x168   :  { %v180_v40 = vmax.f32 %v172_v36, %v709_v35  ;;  %v181_v41 = vmax.f32 %v173_v37, %v710_v34 }
 0x169   :  { %v728_v42 = vpop.permute.xlu1 %727  ;;  %v723_v43 = vpop.permute.xlu0 %722 }
 0x16a   :  { %v188_v46 = vmax.f32 %v180_v40, %v714_v39  ;;  %v189_v47 = vmax.f32 %v181_v41, %v715_v38  ;;  %v725_v48 = vunpack.i.h.bf16 %v723_v43  ;;  %v724_v49 = vunpack.i.l.bf16 %v723_v43 }
 0x16b   :  { %v730_v53 = vunpack.i.h.bf16 %v728_v42  ;;  %v729_v54 = vunpack.i.l.bf16 %v728_v42 }
 0x16c   :  { %v196_v50 = vmax.f32 %v188_v46, %v719_v45  ;;  %v197_v51 = vmax.f32 %v189_v47, %v720_v44 }
 0x16d   :  { %v733_v52 = vpop.permute.xlu0 %732  ;;  %v738_v57 = vpop.permute.xlu1 %737 }
 0x16e   :  { %v204_v55 = vmax.f32 %v196_v50, %v724_v49  ;;  %v205_v56 = vmax.f32 %v197_v51, %v725_v48  ;;  %v735_v58 = vunpack.i.h.bf16 %v733_v52  ;;  %v734_v59 = vunpack.i.l.bf16 %v733_v52 }
 0x16f   :  { %v740_v63 = vunpack.i.h.bf16 %v738_v57  ;;  %v739_v1 = vunpack.i.l.bf16 %v738_v57 }
 0x170   :  { %v212_v60 = vmax.f32 %v204_v55, %v729_v54  ;;  %v213_v61 = vmax.f32 %v205_v56, %v730_v53 }
 0x171   :  { %v743_v62 = vpop.permute.xlu0 %742 }
 0x172   :  { %v220_v2 = vmax.f32 %v212_v60, %v734_v59  ;;  %v221_v3 = vmax.f32 %v213_v61, %v735_v58  ;;  %v745_v4 = vunpack.i.h.bf16 %v743_v62  ;;  %v744_v5 = vunpack.i.l.bf16 %v743_v62  ;;  %v601_v58 = vld [vmem:[%s973_s7 + $0x1] ss:$0 sm:$0xff]  ;;  %s837_s7 = smov [#allocation5]  }
 0x173   :  { %s568_s22 = sshll.u32 %s837_s7, 4  ;;  %s569_s22 = int_to_ptr.vmem [resolvable:$true] %s568_s22 }
 0x174   :  { %v228_v6 = vmax.f32 %v220_v2, %v739_v1  ;;  %v229_v7 = vmax.f32 %v221_v3, %v740_v63  ;;  %s796_s1 = scalar_lea.vmem %s569_s22, 256  ;;  %p801_p6 = scmp.lt.s32.totalorder %s569_s22, %s569_s22 }
 0x175   :  { %p797_p5 = scmp.ne.s32.totalorder %s569_s22, %s796_s1  ;;  %p802_p7 = scmp.lt.s32.totalorder %s796_s1, %s796_s1 }
 0x176   :  { %v236_v8 = vmax.f32 %v228_v6, %v744_v5  ;;  %v237_v9 = vmax.f32 %v229_v7, %v745_v4 }
 0x177   :  { %p803_p8 = por %p802_p7, %p801_p6 }
 0x178   :  { %v238_v11 = vpack.c.bf16 %v237_v9, %v236_v8 }
 0x179   :  { %p804_p9 = pnand %p803_p8, %p797_p5 }
 0x17a   :  { %640 = vmatmul.mubr.msk.bf16.vlgmr.msra.gmra.mxu1 %vm240_vm3, %v238_v11 }
 0x17b   :  { %644 = vmatpush3.bf16.msra.mxu1 %v751_v10  ;;  %651 = vmatprep.mubr.msk.bf16.mxu1 %vm824_vm0, %v823_v0 }
 0x17c   :  { %645 = vmatprep.subr.bf16.mxu1 %v823_v0 }
 0x17f   :  { %646 = vmatpush3.bf16.msra.mxu1 %v752_v12 }
 0x180   :  { %647 = vmatprep.subr.bf16.mxu1 %v823_v0 }
 0x183   :  { %648 = vmatpush3.bf16.msra.mxu1 %v753_v13 }
 0x184   :  { %649 = vmatprep.subr.bf16.mxu1 %v823_v0 }
 0x187   :  { %650 = vmatpush3.bf16.msra.mxu1 %v754_v14 }
 0x188   :  { %663 = vmatprep.subr.bf16.mxu1 %v823_v0 }
 0x18a   :  { %652 = vmatmul.mubr.msk.bf16.vlgmr.msra.gmra.mxu1 %vm101_vm1, %v755_v15 }
 0x18b   :  { %667 = vmatprep.mubr.msk.bf16.mxu1 %vm824_vm0, %v823_v0  ;;  %664 = vmatpush3.bf16.msra.mxu1 %v758_v29 }
 0x18c   :  { %665 = vmatprep.subr.bf16.mxu1 %v823_v0 }
 0x18f   :  { %666 = vmatpush3.bf16.msra.mxu1 %v759_v31 }
 0x23a   :  { %v282_v18 = vpop.f32.mrf.mxu1 }
 0x23c   :  { %v641_v19 = vpop.f32.mrf.mxu1 }
 0x23e   :  { %v285_v20 = vpop.f32.mrf.mxu1 }
 0x240   :  { %v642_v21 = vpop.f32.mrf.mxu1 }
 0x24a   :  { %v355_v22 = vpop.f32.mrf.mxu1 }
 0x24b   :  { %v356_v25 = vadd.f32 %v355_v22, %v282_v18 }
 0x24c   :  { %v653_v23 = vpop.f32.mrf.mxu1 }
 0x24e   :  { %v358_v24 = vpop.f32.mrf.mxu1 }
 0x24f   :  { %v359_v26 = vadd.f32 %v358_v24, %v285_v20 }
 0x250   :  { %v654_v27 = vpop.f32.mrf.mxu1 }
 0x251   :  { %v362_v28 = vpack.c.bf16 %v359_v26, %v356_v25 }
 0x253   :  { %660 = vmatmul.mubr.msk.bf16.vlgmr.msra.gmra.mxu0 %vm386_vm4, %v362_v28 }
 0x313   :  { %v424_v32 = vpop.f32.mrf.mxu0 }
 0x314   :  { %v425_v33 = vadd.f32 %v594_v30, %v424_v32 }
 0x315   :  { %v661_v34 = vpop.f32.mrf.mxu0 }
 0x316   :  { %v443_v35 = vmax.f32 %v425_v33, 0.0  ;;  %v598_v0 = vmul.f32 -1.442695, %v425_v33 }
 0x317   :  { %v427_v36 = vpop.f32.mrf.mxu0 }
 0x318   :  { %v428_v37 = vadd.f32 %v594_v30, %v427_v36  ;;  %447 = vrot.lane.b32.xlu1 %v443_v35, %s836_s19  ;;  %760 = vpow2.f32 %v598_v0 }
 0x319   :  { %v662_v38 = vpop.f32.mrf.mxu0 }
 0x31a   :  { %v444_v39 = vmax.f32 %v428_v37, 0.0  ;;  %v599_v40 = vmul.f32 -1.442695, %v428_v37 }
 0x31c   :  { %449 = vrot.lane.b32.xlu0 %v444_v39, %s836_s19  ;;  %762 = vpow2.f32 %v599_v40 }
 0x325   :  { %v761_v41 = vpop.eup %760 }
 0x326   :  { %v437_v43 = vadd.f32 1.0, %v761_v41 }
 0x328   :  { %764 = vrcp.f32 %v437_v43 }
 0x329   :  { %v763_v42 = vpop.eup %762 }
 0x32a   :  { %v438_v44 = vadd.f32 1.0, %v763_v42 }
 0x32c   :  { %766 = vrcp.f32 %v438_v44 }
 0x335   :  { %v765_v45 = vpop.eup %764 }
 0x336   :  { %v455_v48 = vsub.f32 1.0, %v765_v45 }
 0x338   :  { %v457_v52 = vmul.f32 %v455_v48, %v356_v25 }
 0x339   :  { %v767_v46 = vpop.eup %766 }
 0x33a   :  { %v456_v49 = vsub.f32 1.0, %v767_v46 }
 0x33c   :  { %v458_v54 = vmul.f32 %v456_v49, %v359_v26 }
 0x38a   :  { %v448_v47 = vpop.permute.xlu1 %447 }
 0x38b   :  { %v453_v50 = vmul.f32 %v765_v45, %v448_v47 }
 0x38d   :  { %v459_v55 = vadd.f32 %v457_v52, %v453_v50 }
 0x38e   :  { %v450_v51 = vpop.permute.xlu0 %449 }
 0x38f   :  { %v454_v53 = vmul.f32 %v767_v46, %v450_v51 }
 0x391   :  { %v460_v56 = vadd.f32 %v458_v54, %v454_v53 }
 0x393   :  { %v461_v57 = vpack.c.bf16 %v460_v56, %v459_v55 }
 0x395   :  { %668 = vmatmul.mubr.msk.bf16.vlgmr.msra.gmra.mxu1 %vm386_vm4, %v461_v57 }
 0x455   :  { %v524_v59 = vpop.f32.mrf.mxu1 }
 0x456   :  { %v525_v60 = vadd.f32 %v601_v58, %v524_v59 }
 0x457   :  { %v669_v61 = vpop.f32.mrf.mxu1 }
 0x458   :  { %v543_v62 = vmax.f32 %v525_v60, 0.0  ;;  %v605_v4 = vmul.f32 -1.442695, %v525_v60 }
 0x459   :  { %v527_v63 = vpop.f32.mrf.mxu1 }
 0x45a   :  { %v528_v1 = vadd.f32 %v601_v58, %v527_v63  ;;  %547 = vrot.lane.b32.xlu1 %v543_v62, %s836_s19  ;;  %768 = vpow2.f32 %v605_v4 }
 0x45b   :  { %v670_v2 = vpop.f32.mrf.mxu1 }
 0x45c   :  { %v544_v3 = vmax.f32 %v528_v1, 0.0  ;;  %v606_v5 = vmul.f32 -1.442695, %v528_v1 }
 0x45e   :  { %549 = vrot.lane.b32.xlu0 %v544_v3, %s836_s19  ;;  %770 = vpow2.f32 %v606_v5 }
 0x467   :  { %v769_v6 = vpop.eup %768 }
 0x468   :  { %v537_v7 = vadd.f32 1.0, %v769_v6 }
 0x46a   :  { %772 = vrcp.f32 %v537_v7 }
 0x46b   :  { %v771_v8 = vpop.eup %770 }
 0x46c   :  { %v538_v9 = vadd.f32 1.0, %v771_v8 }
 0x46e   :  { %774 = vrcp.f32 %v538_v9 }
 0x477   :  { %v773_v10 = vpop.eup %772 }
 0x478   :  { %v555_v11 = vsub.f32 1.0, %v773_v10 }
 0x47a   :  { %v557_v15 = vmul.f32 %v555_v11, %v459_v55 }
 0x47b   :  { %v775_v12 = vpop.eup %774 }
 0x47c   :  { %v556_v16 = vsub.f32 1.0, %v775_v12 }
 0x47e   :  { %v558_v20 = vmul.f32 %v556_v16, %v460_v56 }
 0x4cc   :  { %v548_v13 = vpop.permute.xlu1 %547 }
 0x4cd   :  { %v553_v14 = vmul.f32 %v773_v10, %v548_v13 }
 0x4cf   :  { %v559_v17 = vadd.f32 %v557_v15, %v553_v14 }
 0x4d0   :  { %v550_v18 = vpop.permute.xlu0 %549 }
 0x4d1   :  { %561 = vst.msk [vmem:[#allocation5] sm:$0xff] %vm386_vm4, %v559_v17  ;;  %v554_v19 = vmul.f32 %v775_v12, %v550_v18 }
 0x4d3   :  { %v560_v21 = vadd.f32 %v558_v20, %v554_v19 }
 0x4d5   :  { %562 = vst.msk [vmem:[#allocation5 + $0x8] sm:$0xff] %vm386_vm4, %v560_v21 }
 0x4d6   :  { %807 = shalt.err (!%p804_p9)
}
 0x4d7   :  { %s838_s3 = smov 128   ;;  %s839_s23 = smov 8  }
 0x4d8   :  { %574 = dma.vmem_to_hbm [thread:$0]  %s569_s22, 256, %s974_s8, [#allocation4], %s838_s3, %s838_s3, %s839_s23  }
 0x4d9   :  { %818 = dma.done.wait [#allocation4], 256  }
 0x4da   :  { %819 = vsyncadd [#allocation4], 4294967040 }
 0x4db   :  { %578 = vsyncpa [#allocation3], 1 }
 0x4dc   :  { %579 = vsyncpa [#allocation4], 1 }

</bundles_post_ra>
